<compile_context>
chip_gen: v6e
topology: v6e:2x2x1
jax: 0.10.0
libtpu: 0.0.40
codegen_flags: <defaults>
</compile_context>

<pallas_src>
import functools
from typing import NamedTuple

import jax
import jax.numpy as jnp
from jax.experimental import pallas as pl
from jax.experimental.pallas import tpu as pltpu

_LANE = 128      # TPU lane width: every feature axis is padded to a multiple of this
_SUBLANE = 8
_NEG = -1e30     # sentinel logit for padded feature lanes inside sparsemax


def _round_up(n, m):
    return ((n + m - 1) // m) * m


class Dims(NamedTuple):
    input_size: int
    hidden_size: int
    noutput: int
    in_p: int
    h_p: int
    out_p: int


# --------------------------------------------------------------------------- #
# Kernel
# --------------------------------------------------------------------------- #
def _dnn_attention_kernel(
    x_ref, wa_ref, ba_ref, w1_ref, b1_ref, w2_ref, b2_ref, w3_ref, b3_ref,
    out_ref, att_ref, *, n_iter,
):
    f32 = jnp.float32
    x = x_ref[...]                                              # (TB, IN_P) f32

    # ---- attention1 = sparsemax(fca1(x), dim=1) ---------------------------
    # fca1 stays f32: the sparsemax support decision is threshold based.
    # Padded lanes carry z = -1e30 (via the padded fca1 bias), so they never
    # enter the support and get exactly zero attention.
    z = jnp.dot(x, wa_ref[...], preferred_element_type=f32) + ba_ref[...]

    # Exact simplex projection (Michelot, finite-step). Uses only lane
    # reductions + lane broadcasts, so it lowers cleanly on the VPU/XLU.
    def tau_of(mask):
        k = jnp.sum(mask, axis=-1, keepdims=True)               # (TB, 1)
        s = jnp.sum(mask * z, axis=-1, keepdims=True)           # (TB, 1)
        return (s - 1.0) / k                                    # support never empty

    tau = tau_of((z > _NEG / 2).astype(f32))                    # init: real lanes
    for _ in range(n_iter):                                     # <= n_real shrinks
        tau = tau_of((z > tau).astype(f32))
    att = jnp.maximum(z - tau, 0.0)
    att_ref[...] = att.astype(att_ref.dtype)

    # ---- out = fc3(relu(fc2(relu(fc1(x * attention1))))) ------------------
    # nn.Dropout(p=0.5) is the identity in eval/inference mode.
    # TODO(synk): training-mode stochastic dropout (pltpu.prng_*) not emulated.
    cd = w1_ref.dtype              # matmul-input dtype (f32 or bf16); f32 accum
    h = (x * att).astype(cd)
    h1 = jnp.dot(h, w1_ref[...], preferred_element_type=f32) + b1_ref[...]
    h1 = jnp.maximum(h1, 0.0)                                   # f32 bias/ReLU (v5e VPU)
    h2 = jnp.dot(h1.astype(cd), w2_ref[...], preferred_element_type=f32) + b2_ref[...]
    h2 = jnp.maximum(h2, 0.0)
    out = jnp.dot(h2.astype(cd), w3_ref[...], preferred_element_type=f32) + b3_ref[...]
    out_ref[...] = out.astype(out_ref.dtype)


# --------------------------------------------------------------------------- #
# One-time host-side weight preparation (hoisted out of the per-call path)
# --------------------------------------------------------------------------- #
def prepare_params(params, *, compute_dtype=jnp.float32):
    """Transpose PyTorch (out,in) weights to (in,out), zero-pad every feature
    axis to a multiple of 128 lanes, lift biases to (1, N). Padded fca1-bias
    lanes carry -1e30 so padded lanes never enter the sparsemax support.
    Call once and reuse the result."""
    input_size = params["fca1_w"].shape[1]
    hidden_size = params["fc1_w"].shape[0]
    noutput = params["fc3_w"].shape[0]
    in_p = _round_up(input_size, _LANE)
    h_p = _round_up(hidden_size, _LANE)
    out_p = _round_up(noutput, _LANE)
    dims = Dims(input_size, hidden_size, noutput, in_p, h_p, out_p)

    def pad_wt(w, rows, cols, dtype):
        wt = jnp.asarray(w, jnp.float32).T                      # (in, out)
        buf = jnp.zeros((rows, cols), jnp.float32)
        return buf.at[: wt.shape[0], : wt.shape[1]].set(wt).astype(dtype)

    def pad_b(b, cols, fill=0.0):
        b = jnp.asarray(b, jnp.float32)
        buf = jnp.full((1, cols), fill, jnp.float32)
        return buf.at[0, : b.shape[0]].set(b)

    prep = {
        "wa": pad_wt(params["fca1_w"], in_p, in_p, jnp.float32),  # f32 for sparsemax
        "ba": pad_b(params["fca1_b"], in_p, fill=_NEG),
        "w1": pad_wt(params["fc1_w"], in_p, h_p, compute_dtype),
        "b1": pad_b(params["fc1_b"], h_p),
        "w2": pad_wt(params["fc2_w"], h_p, h_p, compute_dtype),
        "b2": pad_b(params["fc2_b"], h_p),
        "w3": pad_wt(params["fc3_w"], h_p, out_p, compute_dtype),
        "b3": pad_b(params["fc3_b"], out_p),
    }
    return prep, dims


# --------------------------------------------------------------------------- #
# Jitted forward wrapper
# --------------------------------------------------------------------------- #
@functools.partial(jax.jit, static_argnums=(2,))
def dnn_net_one_attention(x, prep, dims):
    """Fused forward pass. Returns (out[B, noutput], attention1[B, input_size])."""
    B = x.shape[0]
    in_p, h_p, out_p = dims.in_p, dims.h_p, dims.out_p

    # Batch tiling: multiple of 8 sublanes, capped at 128 MXU rows.
    # (Raise to 256 on v6e/v7x for very large batches if desired.)
    tb = min(128, _round_up(B, _SUBLANE))
    b_pad = _round_up(B, tb)
    nb = b_pad // tb

    xp = jnp.zeros((b_pad, in_p), jnp.float32)
    xp = xp.at[:B, : dims.input_size].set(x.astype(jnp.float32))

    flops = 2 * b_pad * (in_p * in_p + in_p * h_p + h_p * h_p + h_p * out_p)
    bytes_accessed = int(
        xp.size * 4
        + sum(prep[k].size * prep[k].dtype.itemsize
              for k in ("wa", "w1", "w2", "w3", "ba", "b1", "b2", "b3"))
        + b_pad * (out_p + in_p) * 4)

    def wspec(shape):
        return pl.BlockSpec(shape, lambda i: (0, 0))   # constant block -> VMEM-resident

    kernel = functools.partial(_dnn_attention_kernel, n_iter=dims.input_size)

    out, att = pl.pallas_call(
        kernel,
        grid=(nb,),
        in_specs=[
            pl.BlockSpec((tb, in_p), lambda i: (i, 0)),         # x tile
            wspec((in_p, in_p)), wspec((1, in_p)),              # fca1
            wspec((in_p, h_p)), wspec((1, h_p)),                # fc1
            wspec((h_p, h_p)), wspec((1, h_p)),                 # fc2
            wspec((h_p, out_p)), wspec((1, out_p)),             # fc3
        ],
        out_specs=(
            pl.BlockSpec((tb, out_p), lambda i: (i, 0)),        # lane-dense out
            pl.BlockSpec((tb, in_p), lambda i: (i, 0)),         # lane-dense attention
        ),
        out_shape=(
            jax.ShapeDtypeStruct((b_pad, out_p), jnp.float32),
            jax.ShapeDtypeStruct((b_pad, in_p), jnp.float32),
        ),
        compiler_params=pltpu.CompilerParams(
            dimension_semantics=("parallel",)),                 # v7x: use both TCs
        cost_estimate=pl.CostEstimate(
            flops=flops, transcendentals=0, bytes_accessed=bytes_accessed),
    )(xp, prep["wa"], prep["ba"], prep["w1"], prep["b1"],
      prep["w2"], prep["b2"], prep["w3"], prep["b3"])

    return out[:B, : dims.noutput], att[:B, : dims.input_size]


# --------------------------------------------------------------------------- #
# Pure-JAX reference (eval-mode dropout = identity), sort-based sparsemax
# --------------------------------------------------------------------------- #
def _sparsemax_ref(z):
    n = z.shape[-1]
    z_sorted = jnp.flip(jnp.sort(z, axis=-1), axis=-1)
    k = jnp.arange(1, n + 1, dtype=z.dtype)
    z_cumsum = jnp.cumsum(z_sorted, axis=-1)
    support = (1.0 + k * z_sorted) > z_cumsum
    k_z = jnp.sum(support.astype(z.dtype), axis=-1, keepdims=True)
    s_z = jnp.sum(jnp.where(support, z_sorted, 0.0), axis=-1, keepdims=True)
    tau = (s_z - 1.0) / k_z
    return jnp.maximum(z - tau, 0.0)


def _linear(v, w, b):
    return jnp.dot(v, jnp.asarray(w, jnp.float32).T,
                   precision=jax.lax.Precision.HIGHEST) + jnp.asarray(b, jnp.float32)


def _reference(x, params):
    att = _sparsemax_ref(_linear(x, params["fca1_w"], params["fca1_b"]))
    h = jax.nn.relu(_linear(x * att, params["fc1_w"], params["fc1_b"]))
    h = jax.nn.relu(_linear(h, params["fc2_w"], params["fc2_b"]))
    out = _linear(h, params["fc3_w"], params["fc3_b"])
    return out, att


def _init_params(key, input_size, hidden_size, noutput):
    """Deterministic synthetic init (uniform, roughly PyTorch nn.Linear scale)."""
    specs = {
        "fca1": (input_size, input_size),
        "fc1": (hidden_size, input_size),
        "fc2": (hidden_size, hidden_size),
        "fc3": (noutput, hidden_size),
    }
    params = {}
    for name, (fan_out, fan_in) in specs.items():
        key, kw, kb = jax.random.split(key, 3)
        bound = 1.0 / (fan_in ** 0.5)
        params[f"{name}_w"] = jax.random.uniform(
            kw, (fan_out, fan_in), jnp.float32, -bound, bound)
        params[f"{name}_b"] = jax.random.uniform(
            kb, (fan_out,), jnp.float32, -bound, bound)
    return params


if __name__ == "__main__":
    B, input_size, hidden_size, noutput = 8, 16, 32, 8

    key = jax.random.PRNGKey(0)
    kp, kx = jax.random.split(key)
    params = _init_params(kp, input_size, hidden_size, noutput)
    x = jax.random.normal(kx, (B, input_size), jnp.float32)

    ref_out, ref_att = _reference(x, params)

    # f32 matmul-input path.
    prep, dims = prepare_params(params, compute_dtype=jnp.float32)
    out, att = dnn_net_one_attention(x, prep, dims)
    out, att = jax.block_until_ready((out, att))

    assert out.shape == (B, noutput) and att.shape == (B, input_size)
    assert bool(jnp.all(att >= 0.0)), "attention must be non-negative"
    assert jnp.allclose(att.sum(axis=1), 1.0, atol=1e-3), "attention rows must sum to 1"
    assert jnp.allclose(att, ref_att, atol=1e-2, rtol=1e-2), "attention mismatch"
    assert jnp.allclose(out, ref_out, atol=5e-2, rtol=5e-2), "output mismatch"

    # bf16 matmul-input path (v6e/v7x MXU feedback): f32 accumulation, looser tol.
    prep16, dims16 = prepare_params(params, compute_dtype=jnp.bfloat16)
    out16, att16 = dnn_net_one_attention(x, prep16, dims16)
    out16, att16 = jax.block_until_ready((out16, att16))
    assert jnp.allclose(att16, ref_att, atol=1e-2, rtol=1e-2), "bf16 attention mismatch"
    assert jnp.allclose(out16, ref_out, atol=7e-2, rtol=7e-2), "bf16 output mismatch"

    print("KERNEL_OK")
</pallas_src>

<mosaic_0001>
module attributes {stable_mosaic.version = 11 : i64} {
  func.func @_dnn_attention_kernel(%arg0: i32, %arg1: memref<8x128xf32, #tpu.memory_space<vmem>>, %arg2: memref<128x128xf32, #tpu.memory_space<vmem>>, %arg3: memref<1x128xf32, #tpu.memory_space<vmem>>, %arg4: memref<128x128xf32, #tpu.memory_space<vmem>>, %arg5: memref<1x128xf32, #tpu.memory_space<vmem>>, %arg6: memref<128x128xf32, #tpu.memory_space<vmem>>, %arg7: memref<1x128xf32, #tpu.memory_space<vmem>>, %arg8: memref<128x128xf32, #tpu.memory_space<vmem>>, %arg9: memref<1x128xf32, #tpu.memory_space<vmem>>, %arg10: memref<8x128xf32, #tpu.memory_space<vmem>>, %arg11: memref<8x128xf32, #tpu.memory_space<vmem>>) attributes {dimension_semantics = [#tpu.dimension_semantics<parallel>], iteration_bounds = array<i64: 1>, scalar_prefetch = 0 : i64, scratch_operands = 0 : i64, tpu.core_type = #tpu.core_type<tc>, window_params = [{transform_indices = @transform_0, window_bounds = array<i64: 8, 128>}, {pipeline_mode = #tpu.pipeline_mode<synchronous>, transform_indices = @transform_1, window_bounds = array<i64: 128, 128>}, {pipeline_mode = #tpu.pipeline_mode<synchronous>, transform_indices = @transform_2, window_bounds = array<i64: 1, 128>}, {pipeline_mode = #tpu.pipeline_mode<synchronous>, transform_indices = @transform_3, window_bounds = array<i64: 128, 128>}, {pipeline_mode = #tpu.pipeline_mode<synchronous>, transform_indices = @transform_4, window_bounds = array<i64: 1, 128>}, {pipeline_mode = #tpu.pipeline_mode<synchronous>, transform_indices = @transform_5, window_bounds = array<i64: 128, 128>}, {pipeline_mode = #tpu.pipeline_mode<synchronous>, transform_indices = @transform_6, window_bounds = array<i64: 1, 128>}, {pipeline_mode = #tpu.pipeline_mode<synchronous>, transform_indices = @transform_7, window_bounds = array<i64: 128, 128>}, {pipeline_mode = #tpu.pipeline_mode<synchronous>, transform_indices = @transform_8, window_bounds = array<i64: 1, 128>}, {transform_indices = @transform_9, window_bounds = array<i64: 8, 128>}, {transform_indices = @transform_10, window_bounds = array<i64: 8, 128>}]} {
    %c0 = arith.constant 0 : index
    %c0_0 = arith.constant 0 : index
    %0 = vector.load %arg1[%c0, %c0_0] : memref<8x128xf32, #tpu.memory_space<vmem>>, vector<8x128xf32>
    %c0_1 = arith.constant 0 : index
    %c0_2 = arith.constant 0 : index
    %1 = vector.load %arg2[%c0_1, %c0_2] : memref<128x128xf32, #tpu.memory_space<vmem>>, vector<128x128xf32>
    %cst = arith.constant dense<0.000000e+00> : vector<8x128xf32>
    %2 = tpu.matmul %0, %1, %cst {dimension_numbers = #tpu.dot_dimension_numbers<[1], [0], [0], [1], [0, 0, 1, 1], [], []>} : vector<8x128xf32>, vector<128x128xf32>, vector<8x128xf32> -> vector<8x128xf32>
    %c0_3 = arith.constant 0 : index
    %c0_4 = arith.constant 0 : index
    %3 = vector.load %arg3[%c0_3, %c0_4] : memref<1x128xf32, #tpu.memory_space<vmem>>, vector<1x128xf32>
    %4 = vector.broadcast %3 : vector<1x128xf32> to vector<8x128xf32>
    %5 = arith.addf %2, %4 : vector<8x128xf32>
    %cst_5 = arith.constant -5.000000e+29 : f32
    %6 = vector.broadcast %cst_5 : f32 to vector<8x128xf32>
    %7 = arith.cmpf ogt, %5, %6 : vector<8x128xf32>
    %8 = arith.extui %7 : vector<8x128xi1> to vector<8x128xi32>
    %9 = arith.sitofp %8 : vector<8x128xi32> to vector<8x128xf32>
    %cst_6 = arith.constant dense<0.000000e+00> : vector<8xf32>
    %10 = vector.multi_reduction <add>, %9, %cst_6 [1] : vector<8x128xf32> to vector<8xf32>
    %11 = vector.shape_cast %10 : vector<8xf32> to vector<8x1xf32>
    %12 = arith.mulf %9, %5 : vector<8x128xf32>
    %cst_7 = arith.constant dense<0.000000e+00> : vector<8xf32>
    %13 = vector.multi_reduction <add>, %12, %cst_7 [1] : vector<8x128xf32> to vector<8xf32>
    %14 = vector.shape_cast %13 : vector<8xf32> to vector<8x1xf32>
    %cst_8 = arith.constant 1.000000e+00 : f32
    %15 = vector.broadcast %cst_8 : f32 to vector<8x1xf32>
    %16 = arith.subf %14, %15 : vector<8x1xf32>
    %17 = arith.divf %16, %11 : vector<8x1xf32>
    %18 = vector.broadcast %17 : vector<8x1xf32> to vector<8x128xf32>
    %19 = arith.cmpf ogt, %5, %18 : vector<8x128xf32>
    %20 = arith.extui %19 : vector<8x128xi1> to vector<8x128xi32>
    %21 = arith.sitofp %20 : vector<8x128xi32> to vector<8x128xf32>
    %cst_9 = arith.constant dense<0.000000e+00> : vector<8xf32>
    %22 = vector.multi_reduction <add>, %21, %cst_9 [1] : vector<8x128xf32> to vector<8xf32>
    %23 = vector.shape_cast %22 : vector<8xf32> to vector<8x1xf32>
    %24 = arith.mulf %21, %5 : vector<8x128xf32>
    %cst_10 = arith.constant dense<0.000000e+00> : vector<8xf32>
    %25 = vector.multi_reduction <add>, %24, %cst_10 [1] : vector<8x128xf32> to vector<8xf32>
    %26 = vector.shape_cast %25 : vector<8xf32> to vector<8x1xf32>
    %cst_11 = arith.constant 1.000000e+00 : f32
    %27 = vector.broadcast %cst_11 : f32 to vector<8x1xf32>
    %28 = arith.subf %26, %27 : vector<8x1xf32>
    %29 = arith.divf %28, %23 : vector<8x1xf32>
    %30 = vector.broadcast %29 : vector<8x1xf32> to vector<8x128xf32>
    %31 = arith.cmpf ogt, %5, %30 : vector<8x128xf32>
    %32 = arith.extui %31 : vector<8x128xi1> to vector<8x128xi32>
    %33 = arith.sitofp %32 : vector<8x128xi32> to vector<8x128xf32>
    %cst_12 = arith.constant dense<0.000000e+00> : vector<8xf32>
    %34 = vector.multi_reduction <add>, %33, %cst_12 [1] : vector<8x128xf32> to vector<8xf32>
    %35 = vector.shape_cast %34 : vector<8xf32> to vector<8x1xf32>
    %36 = arith.mulf %33, %5 : vector<8x128xf32>
    %cst_13 = arith.constant dense<0.000000e+00> : vector<8xf32>
    %37 = vector.multi_reduction <add>, %36, %cst_13 [1] : vector<8x128xf32> to vector<8xf32>
    %38 = vector.shape_cast %37 : vector<8xf32> to vector<8x1xf32>
    %cst_14 = arith.constant 1.000000e+00 : f32
    %39 = vector.broadcast %cst_14 : f32 to vector<8x1xf32>
    %40 = arith.subf %38, %39 : vector<8x1xf32>
    %41 = arith.divf %40, %35 : vector<8x1xf32>
    %42 = vector.broadcast %41 : vector<8x1xf32> to vector<8x128xf32>
    %43 = arith.cmpf ogt, %5, %42 : vector<8x128xf32>
    %44 = arith.extui %43 : vector<8x128xi1> to vector<8x128xi32>
    %45 = arith.sitofp %44 : vector<8x128xi32> to vector<8x128xf32>
    %cst_15 = arith.constant dense<0.000000e+00> : vector<8xf32>
    %46 = vector.multi_reduction <add>, %45, %cst_15 [1] : vector<8x128xf32> to vector<8xf32>
    %47 = vector.shape_cast %46 : vector<8xf32> to vector<8x1xf32>
    %48 = arith.mulf %45, %5 : vector<8x128xf32>
    %cst_16 = arith.constant dense<0.000000e+00> : vector<8xf32>
    %49 = vector.multi_reduction <add>, %48, %cst_16 [1] : vector<8x128xf32> to vector<8xf32>
    %50 = vector.shape_cast %49 : vector<8xf32> to vector<8x1xf32>
    %cst_17 = arith.constant 1.000000e+00 : f32
    %51 = vector.broadcast %cst_17 : f32 to vector<8x1xf32>
    %52 = arith.subf %50, %51 : vector<8x1xf32>
    %53 = arith.divf %52, %47 : vector<8x1xf32>
    %54 = vector.broadcast %53 : vector<8x1xf32> to vector<8x128xf32>
    %55 = arith.cmpf ogt, %5, %54 : vector<8x128xf32>
    %56 = arith.extui %55 : vector<8x128xi1> to vector<8x128xi32>
    %57 = arith.sitofp %56 : vector<8x128xi32> to vector<8x128xf32>
    %cst_18 = arith.constant dense<0.000000e+00> : vector<8xf32>
    %58 = vector.multi_reduction <add>, %57, %cst_18 [1] : vector<8x128xf32> to vector<8xf32>
    %59 = vector.shape_cast %58 : vector<8xf32> to vector<8x1xf32>
    %60 = arith.mulf %57, %5 : vector<8x128xf32>
    %cst_19 = arith.constant dense<0.000000e+00> : vector<8xf32>
    %61 = vector.multi_reduction <add>, %60, %cst_19 [1] : vector<8x128xf32> to vector<8xf32>
    %62 = vector.shape_cast %61 : vector<8xf32> to vector<8x1xf32>
    %cst_20 = arith.constant 1.000000e+00 : f32
    %63 = vector.broadcast %cst_20 : f32 to vector<8x1xf32>
    %64 = arith.subf %62, %63 : vector<8x1xf32>
    %65 = arith.divf %64, %59 : vector<8x1xf32>
    %66 = vector.broadcast %65 : vector<8x1xf32> to vector<8x128xf32>
    %67 = arith.cmpf ogt, %5, %66 : vector<8x128xf32>
    %68 = arith.extui %67 : vector<8x128xi1> to vector<8x128xi32>
    %69 = arith.sitofp %68 : vector<8x128xi32> to vector<8x128xf32>
    %cst_21 = arith.constant dense<0.000000e+00> : vector<8xf32>
    %70 = vector.multi_reduction <add>, %69, %cst_21 [1] : vector<8x128xf32> to vector<8xf32>
    %71 = vector.shape_cast %70 : vector<8xf32> to vector<8x1xf32>
    %72 = arith.mulf %69, %5 : vector<8x128xf32>
    %cst_22 = arith.constant dense<0.000000e+00> : vector<8xf32>
    %73 = vector.multi_reduction <add>, %72, %cst_22 [1] : vector<8x128xf32> to vector<8xf32>
    %74 = vector.shape_cast %73 : vector<8xf32> to vector<8x1xf32>
    %cst_23 = arith.constant 1.000000e+00 : f32
    %75 = vector.broadcast %cst_23 : f32 to vector<8x1xf32>
    %76 = arith.subf %74, %75 : vector<8x1xf32>
    %77 = arith.divf %76, %71 : vector<8x1xf32>
    %78 = vector.broadcast %77 : vector<8x1xf32> to vector<8x128xf32>
    %79 = arith.cmpf ogt, %5, %78 : vector<8x128xf32>
    %80 = arith.extui %79 : vector<8x128xi1> to vector<8x128xi32>
    %81 = arith.sitofp %80 : vector<8x128xi32> to vector<8x128xf32>
    %cst_24 = arith.constant dense<0.000000e+00> : vector<8xf32>
    %82 = vector.multi_reduction <add>, %81, %cst_24 [1] : vector<8x128xf32> to vector<8xf32>
    %83 = vector.shape_cast %82 : vector<8xf32> to vector<8x1xf32>
    %84 = arith.mulf %81, %5 : vector<8x128xf32>
    %cst_25 = arith.constant dense<0.000000e+00> : vector<8xf32>
    %85 = vector.multi_reduction <add>, %84, %cst_25 [1] : vector<8x128xf32> to vector<8xf32>
    %86 = vector.shape_cast %85 : vector<8xf32> to vector<8x1xf32>
    %cst_26 = arith.constant 1.000000e+00 : f32
    %87 = vector.broadcast %cst_26 : f32 to vector<8x1xf32>
    %88 = arith.subf %86, %87 : vector<8x1xf32>
    %89 = arith.divf %88, %83 : vector<8x1xf32>
    %90 = vector.broadcast %89 : vector<8x1xf32> to vector<8x128xf32>
    %91 = arith.cmpf ogt, %5, %90 : vector<8x128xf32>
    %92 = arith.extui %91 : vector<8x128xi1> to vector<8x128xi32>
    %93 = arith.sitofp %92 : vector<8x128xi32> to vector<8x128xf32>
    %cst_27 = arith.constant dense<0.000000e+00> : vector<8xf32>
    %94 = vector.multi_reduction <add>, %93, %cst_27 [1] : vector<8x128xf32> to vector<8xf32>
    %95 = vector.shape_cast %94 : vector<8xf32> to vector<8x1xf32>
    %96 = arith.mulf %93, %5 : vector<8x128xf32>
    %cst_28 = arith.constant dense<0.000000e+00> : vector<8xf32>
    %97 = vector.multi_reduction <add>, %96, %cst_28 [1] : vector<8x128xf32> to vector<8xf32>
    %98 = vector.shape_cast %97 : vector<8xf32> to vector<8x1xf32>
    %cst_29 = arith.constant 1.000000e+00 : f32
    %99 = vector.broadcast %cst_29 : f32 to vector<8x1xf32>
    %100 = arith.subf %98, %99 : vector<8x1xf32>
    %101 = arith.divf %100, %95 : vector<8x1xf32>
    %102 = vector.broadcast %101 : vector<8x1xf32> to vector<8x128xf32>
    %103 = arith.cmpf ogt, %5, %102 : vector<8x128xf32>
    %104 = arith.extui %103 : vector<8x128xi1> to vector<8x128xi32>
    %105 = arith.sitofp %104 : vector<8x128xi32> to vector<8x128xf32>
    %cst_30 = arith.constant dense<0.000000e+00> : vector<8xf32>
    %106 = vector.multi_reduction <add>, %105, %cst_30 [1] : vector<8x128xf32> to vector<8xf32>
    %107 = vector.shape_cast %106 : vector<8xf32> to vector<8x1xf32>
    %108 = arith.mulf %105, %5 : vector<8x128xf32>
    %cst_31 = arith.constant dense<0.000000e+00> : vector<8xf32>
    %109 = vector.multi_reduction <add>, %108, %cst_31 [1] : vector<8x128xf32> to vector<8xf32>
    %110 = vector.shape_cast %109 : vector<8xf32> to vector<8x1xf32>
    %cst_32 = arith.constant 1.000000e+00 : f32
    %111 = vector.broadcast %cst_32 : f32 to vector<8x1xf32>
    %112 = arith.subf %110, %111 : vector<8x1xf32>
    %113 = arith.divf %112, %107 : vector<8x1xf32>
    %114 = vector.broadcast %113 : vector<8x1xf32> to vector<8x128xf32>
    %115 = arith.cmpf ogt, %5, %114 : vector<8x128xf32>
    %116 = arith.extui %115 : vector<8x128xi1> to vector<8x128xi32>
    %117 = arith.sitofp %116 : vector<8x128xi32> to vector<8x128xf32>
    %cst_33 = arith.constant dense<0.000000e+00> : vector<8xf32>
    %118 = vector.multi_reduction <add>, %117, %cst_33 [1] : vector<8x128xf32> to vector<8xf32>
    %119 = vector.shape_cast %118 : vector<8xf32> to vector<8x1xf32>
    %120 = arith.mulf %117, %5 : vector<8x128xf32>
    %cst_34 = arith.constant dense<0.000000e+00> : vector<8xf32>
    %121 = vector.multi_reduction <add>, %120, %cst_34 [1] : vector<8x128xf32> to vector<8xf32>
    %122 = vector.shape_cast %121 : vector<8xf32> to vector<8x1xf32>
    %cst_35 = arith.constant 1.000000e+00 : f32
    %123 = vector.broadcast %cst_35 : f32 to vector<8x1xf32>
    %124 = arith.subf %122, %123 : vector<8x1xf32>
    %125 = arith.divf %124, %119 : vector<8x1xf32>
    %126 = vector.broadcast %125 : vector<8x1xf32> to vector<8x128xf32>
    %127 = arith.cmpf ogt, %5, %126 : vector<8x128xf32>
    %128 = arith.extui %127 : vector<8x128xi1> to vector<8x128xi32>
    %129 = arith.sitofp %128 : vector<8x128xi32> to vector<8x128xf32>
    %cst_36 = arith.constant dense<0.000000e+00> : vector<8xf32>
    %130 = vector.multi_reduction <add>, %129, %cst_36 [1] : vector<8x128xf32> to vector<8xf32>
    %131 = vector.shape_cast %130 : vector<8xf32> to vector<8x1xf32>
    %132 = arith.mulf %129, %5 : vector<8x128xf32>
    %cst_37 = arith.constant dense<0.000000e+00> : vector<8xf32>
    %133 = vector.multi_reduction <add>, %132, %cst_37 [1] : vector<8x128xf32> to vector<8xf32>
    %134 = vector.shape_cast %133 : vector<8xf32> to vector<8x1xf32>
    %cst_38 = arith.constant 1.000000e+00 : f32
    %135 = vector.broadcast %cst_38 : f32 to vector<8x1xf32>
    %136 = arith.subf %134, %135 : vector<8x1xf32>
    %137 = arith.divf %136, %131 : vector<8x1xf32>
    %138 = vector.broadcast %137 : vector<8x1xf32> to vector<8x128xf32>
    %139 = arith.cmpf ogt, %5, %138 : vector<8x128xf32>
    %140 = arith.extui %139 : vector<8x128xi1> to vector<8x128xi32>
    %141 = arith.sitofp %140 : vector<8x128xi32> to vector<8x128xf32>
    %cst_39 = arith.constant dense<0.000000e+00> : vector<8xf32>
    %142 = vector.multi_reduction <add>, %141, %cst_39 [1] : vector<8x128xf32> to vector<8xf32>
    %143 = vector.shape_cast %142 : vector<8xf32> to vector<8x1xf32>
    %144 = arith.mulf %141, %5 : vector<8x128xf32>
    %cst_40 = arith.constant dense<0.000000e+00> : vector<8xf32>
    %145 = vector.multi_reduction <add>, %144, %cst_40 [1] : vector<8x128xf32> to vector<8xf32>
    %146 = vector.shape_cast %145 : vector<8xf32> to vector<8x1xf32>
    %cst_41 = arith.constant 1.000000e+00 : f32
    %147 = vector.broadcast %cst_41 : f32 to vector<8x1xf32>
    %148 = arith.subf %146, %147 : vector<8x1xf32>
    %149 = arith.divf %148, %143 : vector<8x1xf32>
    %150 = vector.broadcast %149 : vector<8x1xf32> to vector<8x128xf32>
    %151 = arith.cmpf ogt, %5, %150 : vector<8x128xf32>
    %152 = arith.extui %151 : vector<8x128xi1> to vector<8x128xi32>
    %153 = arith.sitofp %152 : vector<8x128xi32> to vector<8x128xf32>
    %cst_42 = arith.constant dense<0.000000e+00> : vector<8xf32>
    %154 = vector.multi_reduction <add>, %153, %cst_42 [1] : vector<8x128xf32> to vector<8xf32>
    %155 = vector.shape_cast %154 : vector<8xf32> to vector<8x1xf32>
    %156 = arith.mulf %153, %5 : vector<8x128xf32>
    %cst_43 = arith.constant dense<0.000000e+00> : vector<8xf32>
    %157 = vector.multi_reduction <add>, %156, %cst_43 [1] : vector<8x128xf32> to vector<8xf32>
    %158 = vector.shape_cast %157 : vector<8xf32> to vector<8x1xf32>
    %cst_44 = arith.constant 1.000000e+00 : f32
    %159 = vector.broadcast %cst_44 : f32 to vector<8x1xf32>
    %160 = arith.subf %158, %159 : vector<8x1xf32>
    %161 = arith.divf %160, %155 : vector<8x1xf32>
    %162 = vector.broadcast %161 : vector<8x1xf32> to vector<8x128xf32>
    %163 = arith.cmpf ogt, %5, %162 : vector<8x128xf32>
    %164 = arith.extui %163 : vector<8x128xi1> to vector<8x128xi32>
    %165 = arith.sitofp %164 : vector<8x128xi32> to vector<8x128xf32>
    %cst_45 = arith.constant dense<0.000000e+00> : vector<8xf32>
    %166 = vector.multi_reduction <add>, %165, %cst_45 [1] : vector<8x128xf32> to vector<8xf32>
    %167 = vector.shape_cast %166 : vector<8xf32> to vector<8x1xf32>
    %168 = arith.mulf %165, %5 : vector<8x128xf32>
    %cst_46 = arith.constant dense<0.000000e+00> : vector<8xf32>
    %169 = vector.multi_reduction <add>, %168, %cst_46 [1] : vector<8x128xf32> to vector<8xf32>
    %170 = vector.shape_cast %169 : vector<8xf32> to vector<8x1xf32>
    %cst_47 = arith.constant 1.000000e+00 : f32
    %171 = vector.broadcast %cst_47 : f32 to vector<8x1xf32>
    %172 = arith.subf %170, %171 : vector<8x1xf32>
    %173 = arith.divf %172, %167 : vector<8x1xf32>
    %174 = vector.broadcast %173 : vector<8x1xf32> to vector<8x128xf32>
    %175 = arith.cmpf ogt, %5, %174 : vector<8x128xf32>
    %176 = arith.extui %175 : vector<8x128xi1> to vector<8x128xi32>
    %177 = arith.sitofp %176 : vector<8x128xi32> to vector<8x128xf32>
    %cst_48 = arith.constant dense<0.000000e+00> : vector<8xf32>
    %178 = vector.multi_reduction <add>, %177, %cst_48 [1] : vector<8x128xf32> to vector<8xf32>
    %179 = vector.shape_cast %178 : vector<8xf32> to vector<8x1xf32>
    %180 = arith.mulf %177, %5 : vector<8x128xf32>
    %cst_49 = arith.constant dense<0.000000e+00> : vector<8xf32>
    %181 = vector.multi_reduction <add>, %180, %cst_49 [1] : vector<8x128xf32> to vector<8xf32>
    %182 = vector.shape_cast %181 : vector<8xf32> to vector<8x1xf32>
    %cst_50 = arith.constant 1.000000e+00 : f32
    %183 = vector.broadcast %cst_50 : f32 to vector<8x1xf32>
    %184 = arith.subf %182, %183 : vector<8x1xf32>
    %185 = arith.divf %184, %179 : vector<8x1xf32>
    %186 = vector.broadcast %185 : vector<8x1xf32> to vector<8x128xf32>
    %187 = arith.cmpf ogt, %5, %186 : vector<8x128xf32>
    %188 = arith.extui %187 : vector<8x128xi1> to vector<8x128xi32>
    %189 = arith.sitofp %188 : vector<8x128xi32> to vector<8x128xf32>
    %cst_51 = arith.constant dense<0.000000e+00> : vector<8xf32>
    %190 = vector.multi_reduction <add>, %189, %cst_51 [1] : vector<8x128xf32> to vector<8xf32>
    %191 = vector.shape_cast %190 : vector<8xf32> to vector<8x1xf32>
    %192 = arith.mulf %189, %5 : vector<8x128xf32>
    %cst_52 = arith.constant dense<0.000000e+00> : vector<8xf32>
    %193 = vector.multi_reduction <add>, %192, %cst_52 [1] : vector<8x128xf32> to vector<8xf32>
    %194 = vector.shape_cast %193 : vector<8xf32> to vector<8x1xf32>
    %cst_53 = arith.constant 1.000000e+00 : f32
    %195 = vector.broadcast %cst_53 : f32 to vector<8x1xf32>
    %196 = arith.subf %194, %195 : vector<8x1xf32>
    %197 = arith.divf %196, %191 : vector<8x1xf32>
    %198 = vector.broadcast %197 : vector<8x1xf32> to vector<8x128xf32>
    %199 = arith.cmpf ogt, %5, %198 : vector<8x128xf32>
    %200 = arith.extui %199 : vector<8x128xi1> to vector<8x128xi32>
    %201 = arith.sitofp %200 : vector<8x128xi32> to vector<8x128xf32>
    %cst_54 = arith.constant dense<0.000000e+00> : vector<8xf32>
    %202 = vector.multi_reduction <add>, %201, %cst_54 [1] : vector<8x128xf32> to vector<8xf32>
    %203 = vector.shape_cast %202 : vector<8xf32> to vector<8x1xf32>
    %204 = arith.mulf %201, %5 : vector<8x128xf32>
    %cst_55 = arith.constant dense<0.000000e+00> : vector<8xf32>
    %205 = vector.multi_reduction <add>, %204, %cst_55 [1] : vector<8x128xf32> to vector<8xf32>
    %206 = vector.shape_cast %205 : vector<8xf32> to vector<8x1xf32>
    %cst_56 = arith.constant 1.000000e+00 : f32
    %207 = vector.broadcast %cst_56 : f32 to vector<8x1xf32>
    %208 = arith.subf %206, %207 : vector<8x1xf32>
    %209 = arith.divf %208, %203 : vector<8x1xf32>
    %210 = vector.broadcast %209 : vector<8x1xf32> to vector<8x128xf32>
    %211 = arith.subf %5, %210 : vector<8x128xf32>
    %cst_57 = arith.constant 0.000000e+00 : f32
    %212 = vector.broadcast %cst_57 : f32 to vector<8x128xf32>
    %213 = arith.maximumf %211, %212 : vector<8x128xf32>
    %c0_58 = arith.constant 0 : index
    %c0_59 = arith.constant 0 : index
    %214 = vector.load %arg11[%c0_58, %c0_59] : memref<8x128xf32, #tpu.memory_space<vmem>>, vector<8x128xf32>
    tpu.vector_store %arg11[%c0_58, %c0_59], %213 {strides = array<i32>} : memref<8x128xf32, #tpu.memory_space<vmem>>, vector<8x128xf32>,
    %215 = arith.mulf %0, %213 : vector<8x128xf32>
    %c0_60 = arith.constant 0 : index
    %c0_61 = arith.constant 0 : index
    %216 = vector.load %arg4[%c0_60, %c0_61] : memref<128x128xf32, #tpu.memory_space<vmem>>, vector<128x128xf32>
    %cst_62 = arith.constant dense<0.000000e+00> : vector<8x128xf32>
    %217 = tpu.matmul %215, %216, %cst_62 {dimension_numbers = #tpu.dot_dimension_numbers<[1], [0], [0], [1], [0, 0, 1, 1], [], []>} : vector<8x128xf32>, vector<128x128xf32>, vector<8x128xf32> -> vector<8x128xf32>
    %c0_63 = arith.constant 0 : index
    %c0_64 = arith.constant 0 : index
    %218 = vector.load %arg5[%c0_63, %c0_64] : memref<1x128xf32, #tpu.memory_space<vmem>>, vector<1x128xf32>
    %219 = vector.broadcast %218 : vector<1x128xf32> to vector<8x128xf32>
    %220 = arith.addf %217, %219 : vector<8x128xf32>
    %cst_65 = arith.constant 0.000000e+00 : f32
    %221 = vector.broadcast %cst_65 : f32 to vector<8x128xf32>
    %222 = arith.maximumf %220, %221 : vector<8x128xf32>
    %c0_66 = arith.constant 0 : index
    %c0_67 = arith.constant 0 : index
    %223 = vector.load %arg6[%c0_66, %c0_67] : memref<128x128xf32, #tpu.memory_space<vmem>>, vector<128x128xf32>
    %cst_68 = arith.constant dense<0.000000e+00> : vector<8x128xf32>
    %224 = tpu.matmul %222, %223, %cst_68 {dimension_numbers = #tpu.dot_dimension_numbers<[1], [0], [0], [1], [0, 0, 1, 1], [], []>} : vector<8x128xf32>, vector<128x128xf32>, vector<8x128xf32> -> vector<8x128xf32>
    %c0_69 = arith.constant 0 : index
    %c0_70 = arith.constant 0 : index
    %225 = vector.load %arg7[%c0_69, %c0_70] : memref<1x128xf32, #tpu.memory_space<vmem>>, vector<1x128xf32>
    %226 = vector.broadcast %225 : vector<1x128xf32> to vector<8x128xf32>
    %227 = arith.addf %224, %226 : vector<8x128xf32>
    %cst_71 = arith.constant 0.000000e+00 : f32
    %228 = vector.broadcast %cst_71 : f32 to vector<8x128xf32>
    %229 = arith.maximumf %227, %228 : vector<8x128xf32>
    %c0_72 = arith.constant 0 : index
    %c0_73 = arith.constant 0 : index
    %230 = vector.load %arg8[%c0_72, %c0_73] : memref<128x128xf32, #tpu.memory_space<vmem>>, vector<128x128xf32>
    %cst_74 = arith.constant dense<0.000000e+00> : vector<8x128xf32>
    %231 = tpu.matmul %229, %230, %cst_74 {dimension_numbers = #tpu.dot_dimension_numbers<[1], [0], [0], [1], [0, 0, 1, 1], [], []>} : vector<8x128xf32>, vector<128x128xf32>, vector<8x128xf32> -> vector<8x128xf32>
    %c0_75 = arith.constant 0 : index
    %c0_76 = arith.constant 0 : index
    %232 = vector.load %arg9[%c0_75, %c0_76] : memref<1x128xf32, #tpu.memory_space<vmem>>, vector<1x128xf32>
    %233 = vector.broadcast %232 : vector<1x128xf32> to vector<8x128xf32>
    %234 = arith.addf %231, %233 : vector<8x128xf32>
    %c0_77 = arith.constant 0 : index
    %c0_78 = arith.constant 0 : index
    %235 = vector.load %arg10[%c0_77, %c0_78] : memref<8x128xf32, #tpu.memory_space<vmem>>, vector<8x128xf32>
    tpu.vector_store %arg10[%c0_77, %c0_78], %234 {strides = array<i32>} : memref<8x128xf32, #tpu.memory_space<vmem>>, vector<8x128xf32>,
    return
  }
  func.func @transform_0(%arg0: i32) -> (i32, i32) {
    %c0_i32 = arith.constant 0 : i32
    %c0_i32_0 = arith.constant 0 : i32
    return %arg0, %c0_i32 : i32, i32
  }
  func.func @transform_1(%arg0: i32) -> (i32, i32) {
    %c0_i32 = arith.constant 0 : i32
    %c0_i32_0 = arith.constant 0 : i32
    %c0_i32_1 = arith.constant 0 : i32
    return %c0_i32, %c0_i32_0 : i32, i32
  }
  func.func @transform_2(%arg0: i32) -> (i32, i32) {
    %c0_i32 = arith.constant 0 : i32
    %c0_i32_0 = arith.constant 0 : i32
    %c0_i32_1 = arith.constant 0 : i32
    return %c0_i32, %c0_i32_0 : i32, i32
  }
  func.func @transform_3(%arg0: i32) -> (i32, i32) {
    %c0_i32 = arith.constant 0 : i32
    %c0_i32_0 = arith.constant 0 : i32
    %c0_i32_1 = arith.constant 0 : i32
    return %c0_i32, %c0_i32_0 : i32, i32
  }
  func.func @transform_4(%arg0: i32) -> (i32, i32) {
    %c0_i32 = arith.constant 0 : i32
    %c0_i32_0 = arith.constant 0 : i32
    %c0_i32_1 = arith.constant 0 : i32
    return %c0_i32, %c0_i32_0 : i32, i32
  }
  func.func @transform_5(%arg0: i32) -> (i32, i32) {
    %c0_i32 = arith.constant 0 : i32
    %c0_i32_0 = arith.constant 0 : i32
    %c0_i32_1 = arith.constant 0 : i32
    return %c0_i32, %c0_i32_0 : i32, i32
  }
  func.func @transform_6(%arg0: i32) -> (i32, i32) {
    %c0_i32 = arith.constant 0 : i32
    %c0_i32_0 = arith.constant 0 : i32
    %c0_i32_1 = arith.constant 0 : i32
    return %c0_i32, %c0_i32_0 : i32, i32
  }
  func.func @transform_7(%arg0: i32) -> (i32, i32) {
    %c0_i32 = arith.constant 0 : i32
    %c0_i32_0 = arith.constant 0 : i32
    %c0_i32_1 = arith.constant 0 : i32
    return %c0_i32, %c0_i32_0 : i32, i32
  }
  func.func @transform_8(%arg0: i32) -> (i32, i32) {
    %c0_i32 = arith.constant 0 : i32
    %c0_i32_0 = arith.constant 0 : i32
    %c0_i32_1 = arith.constant 0 : i32
    return %c0_i32, %c0_i32_0 : i32, i32
  }
  func.func @transform_9(%arg0: i32) -> (i32, i32) {
    %c0_i32 = arith.constant 0 : i32
    %c0_i32_0 = arith.constant 0 : i32
    return %arg0, %c0_i32 : i32, i32
  }
  func.func @transform_10(%arg0: i32) -> (i32, i32) {
    %c0_i32 = arith.constant 0 : i32
    %c0_i32_0 = arith.constant 0 : i32
    return %arg0, %c0_i32 : i32, i32
  }
}

</mosaic_0001>

<bundles_post_ra>
// kernel: dnn_net_one_attention.1
= control target key start
LH: loop header
LB: loop body
LE: loop exit
PB: predicated region body
PF: predicated region fallthrough
CT: control target
= control target key end

     0   :  { %16 = vsyncpa [#allocation3], 0  ;;  %s1349_s0 = inlined_call_operand.vmem [shape: f32[8,128], index: 0, kind: input, shape index: {}]   ;;  %s1350_s1 = inlined_call_operand.hbm [shape: f32[128,128], index: 1, kind: input, shape index: {}]   ;;  %s1351_s2 = inlined_call_operand.vmem [shape: f32[1,128], index: 2, kind: input, shape index: {}]   ;;  %s1352_s3 = inlined_call_operand.hbm [shape: f32[128,128], index: 3, kind: input, shape index: {}]   ;;  %s1353_s4 = inlined_call_operand.vmem [shape: f32[1,128], index: 4, kind: input, shape index: {}]   ;;  %s1354_s5 = inlined_call_operand.hbm [shape: f32[128,128], index: 5, kind: input, shape index: {}]   ;;  %s1355_s6 = inlined_call_operand.vmem [shape: f32[1,128], index: 6, kind: input, shape index: {}]   ;;  %s1356_s7 = inlined_call_operand.hbm [shape: f32[128,128], index: 7, kind: input, shape index: {}]   ;;  %s1357_s8 = inlined_call_operand.vmem [shape: f32[1,128], index: 8, kind: input, shape index: {}]   ;;  %s1358_s9 = inlined_call_operand.hbm [shape: f32[8,128], index: 9, kind: output, shape index: {0}]   ;;  %s1359_s10 = inlined_call_operand.hbm [shape: f32[8,128], index: 10, kind: output, shape index: {1}]  }
   0x1   :  { %17 = vsyncpa [#allocation6], 0 }
   0x2   :  { %18 = vsyncpa [#allocation9], 0 }
   0x3   :  { %19 = vsyncpa [#allocation4], 0 }
   0x4   :  { %20 = vsyncpa [#allocation12], 0  ;;  %s1109_s13 = smov [#allocation5]   ;;  %s1110_s15 = smov [#allocation2]  }
   0x5   :  { %s42_s14 = sshll.u32 %s1109_s13, 4  ;;  %s28_s16 = sshll.u32 %s1110_s15, 4  ;;  %s43_s14 = int_to_ptr.vmem [resolvable:$true] %s42_s14  ;;  %s29_s16 = int_to_ptr.vmem [resolvable:$true] %s28_s16 }
   0x6   :  { %s987_s17 = scalar_lea.vmem %s43_s14, 2048  ;;  %p992_p1 = scmp.lt.s32.totalorder %s43_s14, %s43_s14 }
   0x7   :  { %p988_p0 = scmp.ne.s32.totalorder %s43_s14, %s987_s17  ;;  %p993_p2 = scmp.lt.s32.totalorder %s987_s17, %s987_s17 }
   0x9   :  { %p994_p3 = por %p993_p2, %p992_p1 }
   0xb   :  { %p995_p4 = pnand %p994_p3, %p988_p0 }
   0xd   :  { %998 = shalt.err (!%p995_p4)
}
   0xe   :  { %s1111_s18 = smov 128   ;;  %s1112_s19 = smov 8  }
   0xf   :  { %48 = dma.hbm_to_vmem [thread:$0]  %s1352_s3, 2048, %s43_s14, [#allocation6], %s1111_s18, %s1111_s18, %s1112_s19  }
  0x10   :  { %s1007_s22 = scalar_lea.vmem %s29_s16, 2048  ;;  %p1012_p6 = scmp.lt.s32.totalorder %s29_s16, %s29_s16 }
  0x11   :  { %p1008_p5 = scmp.ne.s32.totalorder %s29_s16, %s1007_s22  ;;  %p1013_p7 = scmp.lt.s32.totalorder %s1007_s22, %s1007_s22 }
  0x13   :  { %p1014_p8 = por %p1013_p7, %p1012_p6 }
  0x15   :  { %p1015_p9 = pnand %p1014_p8, %p1008_p5 }
  0x17   :  { %1018 = shalt.err (!%p1015_p9)
}
  0x18   :  { %34 = dma.hbm_to_vmem [thread:$0]  %s1350_s1, 2048, %s29_s16, [#allocation3], %s1111_s18, %s1111_s18, %s1112_s19  }
  0x19   :  { %s1113_s25 = smov [#allocation7]   ;;  %s1114_s27 = smov [#allocation8]  }
  0x1a   :  { %s56_s26 = sshll.u32 %s1113_s25, 4  ;;  %s70_s28 = sshll.u32 %s1114_s27, 4  ;;  %s57_s26 = int_to_ptr.vmem [resolvable:$true] %s56_s26  ;;  %s71_s28 = int_to_ptr.vmem [resolvable:$true] %s70_s28 }
  0x1b   :  { %s1027_s3 = scalar_lea.vmem %s57_s26, 2048  ;;  %p1032_p11 = scmp.lt.s32.totalorder %s57_s26, %s57_s26 }
  0x1c   :  { %p1028_p10 = scmp.ne.s32.totalorder %s57_s26, %s1027_s3  ;;  %p1033_p12 = scmp.lt.s32.totalorder %s1027_s3, %s1027_s3 }
  0x1e   :  { %p1034_p13 = por %p1033_p12, %p1032_p11 }
  0x20   :  { %p1035_p0 = pnand %p1034_p13, %p1028_p10 }
  0x22   :  { %1038 = shalt.err (!%p1035_p0)
}
  0x23   :  { %62 = dma.hbm_to_vmem [thread:$0]  %s1354_s5, 2048, %s57_s26, [#allocation6], %s1111_s18, %s1111_s18, %s1112_s19  }
  0x24   :  { %s1047_s1 = scalar_lea.vmem %s71_s28, 2048  ;;  %p1052_p2 = scmp.lt.s32.totalorder %s71_s28, %s71_s28 }
  0x25   :  { %p1048_p1 = scmp.ne.s32.totalorder %s71_s28, %s1047_s1  ;;  %p1053_p3 = scmp.lt.s32.totalorder %s1047_s1, %s1047_s1 }
  0x27   :  { %p1054_p4 = por %p1053_p3, %p1052_p2 }
  0x29   :  { %p1055_p5 = pnand %p1054_p4, %p1048_p1 }
  0x2b   :  { %1058 = shalt.err (!%p1055_p5)
}
  0x2c   :  { %76 = dma.hbm_to_vmem [thread:$0]  %s1356_s7, 2048, %s71_s28, [#allocation9], %s1111_s18, %s1111_s18, %s1112_s19  }
  0x2d   :  { %1099 = dma.done.wait [#allocation3], 2048  }
  0x2e   :  { %1100 = vsyncadd [#allocation3], 4294965248 }
  0x2f   :  { %1101 = dma.done.wait [#allocation6], 4096  }
  0x30   :  { %1102 = vsyncadd [#allocation6], 4294963200 }
  0x31   :  { %1103 = dma.done.wait [#allocation9], 2048  }
  0x32   :  { %1104 = vsyncadd [#allocation9], 4294965248  ;;  %v1115_v0 = vmov 0.0   ;;  %vm1116_vm0 = vmmov 0   ;;  %v107_v1 = vld [vmem:[#allocation2 + $0x78] sm:$0xff]  ;;  %v106_v2 = vld [vmem:[#allocation2 + $0x70] sm:$0xff] }
  0x33   :  { %795 = vmatprep.subr.mxu0 %v1115_v0  ;;  %827 = vmatprep.mubr.msk.f32.mxu0 %vm1116_vm0, %v1115_v0  ;;  %v105_v3 = vld [vmem:[#allocation2 + $0x68] sm:$0xff]  ;;  %v104_v4 = vld [vmem:[#allocation2 + $0x60] sm:$0xff]  ;;  %v103_v5 = vld [vmem:[#allocation2 + $0x58] sm:$0xff] }
  0x34   :  { %830 = vmatprep.subr.mxu1 %v1115_v0  ;;  %862 = vmatprep.mubr.msk.f32.mxu1 %vm1116_vm0, %v1115_v0  ;;  %v102_v6 = vld [vmem:[#allocation2 + $0x50] sm:$0xff]  ;;  %v101_v7 = vld [vmem:[#allocation2 + $0x48] sm:$0xff]  ;;  %v100_v8 = vld [vmem:[#allocation2 + $0x40] sm:$0xff] }
  0x35   :  { %796 = vmatpush3.msra.mxu0 %v107_v1  ;;  %v99_v9 = vld [vmem:[#allocation2 + $0x38] sm:$0xff]  ;;  %v98_v10 = vld [vmem:[#allocation2 + $0x30] sm:$0xff]  ;;  %v97_v11 = vld [vmem:[#allocation2 + $0x28] sm:$0xff] }
  0x36   :  { %797 = vmatprep.subr.mxu0 %v1115_v0  ;;  %v96_v12 = vld [vmem:[#allocation2 + $0x20] sm:$0xff]  ;;  %v95_v13 = vld [vmem:[#allocation2 + $0x18] sm:$0xff]  ;;  %v94_v14 = vld [vmem:[#allocation2 + $0x10] sm:$0xff] }
  0x37   :  { %798 = vmatpush3.msra.mxu0 %v106_v2  ;;  %v93_v15 = vld [vmem:[#allocation2 + $0x8] sm:$0xff]  ;;  %v92_v16 = vld [vmem:[#allocation2] sm:$0xff] }
  0x38   :  { %799 = vmatprep.subr.mxu0 %v1115_v0  ;;  %v1221_v17 = vld [vmem:[%s1349_s0] sm:$0xff] }
  0x39   :  { %800 = vmatpush3.msra.mxu0 %v105_v3  ;;  %v689_v18 = vld [vmem:[%s1351_s2] ss:$0 sm:$0xff] }
  0x3a   :  { %801 = vmatprep.subr.mxu0 %v1115_v0 }
  0x3b   :  { %802 = vmatpush3.msra.mxu0 %v104_v4 }
  0x3c   :  { %803 = vmatprep.subr.mxu0 %v1115_v0 }
  0x3d   :  { %804 = vmatpush3.msra.mxu0 %v103_v5 }
  0x3e   :  { %805 = vmatprep.subr.mxu0 %v1115_v0 }
  0x3f   :  { %806 = vmatpush3.msra.mxu0 %v102_v6 }
  0x40   :  { %807 = vmatprep.subr.mxu0 %v1115_v0 }
  0x41   :  { %808 = vmatpush3.msra.mxu0 %v101_v7 }
  0x42   :  { %809 = vmatprep.subr.mxu0 %v1115_v0 }
  0x43   :  { %810 = vmatpush3.msra.mxu0 %v100_v8 }
  0x44   :  { %811 = vmatprep.subr.mxu0 %v1115_v0 }
  0x45   :  { %812 = vmatpush3.msra.mxu0 %v99_v9 }
  0x46   :  { %813 = vmatprep.subr.mxu0 %v1115_v0 }
  0x47   :  { %814 = vmatpush3.msra.mxu0 %v98_v10 }
  0x48   :  { %815 = vmatprep.subr.mxu0 %v1115_v0 }
  0x49   :  { %816 = vmatpush3.msra.mxu0 %v97_v11 }
  0x4a   :  { %817 = vmatprep.subr.mxu0 %v1115_v0 }
  0x4b   :  { %818 = vmatpush3.msra.mxu0 %v96_v12 }
  0x4c   :  { %819 = vmatprep.subr.mxu0 %v1115_v0 }
  0x4d   :  { %820 = vmatpush3.msra.mxu0 %v95_v13 }
  0x4e   :  { %821 = vmatprep.subr.mxu0 %v1115_v0 }
  0x4f   :  { %822 = vmatpush3.msra.mxu0 %v94_v14 }
  0x50   :  { %823 = vmatprep.subr.mxu0 %v1115_v0 }
  0x51   :  { %824 = vmatpush3.msra.mxu0 %v93_v15 }
  0x52   :  { %825 = vmatprep.subr.mxu0 %v1115_v0 }
  0x53   :  { %826 = vmatpush3.msra.mxu0 %v92_v16 }
  0x54   :  { %828 = vmatmul.mubr.f32.vlgmr.msra.gmra.mxu0 %v1221_v17  ;;  %865 = vmatprep.subr.mxu0 %v1115_v0 }
  0x55   :  { %897 = vmatprep.mubr.msk.f32.mxu0 %vm1116_vm0, %v1115_v0 }
 0x114   :  { %v181_v19 = vpop.f32.mrf.mxu0 }
 0x115   :  { %v1231_v20 = vadd.f32 %v689_v18, %v181_v19 }
 0x116   :  { %v829_v21 = vpop.f32.mrf.mxu0 }
 0x117   :  { %vm185_vm1 = vcmp.gt.f32.partialorder %v1231_v20, -5e+29 }
 0x118   :  { %v690_v22 = vsel %vm185_vm1, 1.0, %v1115_v0 }
 0x119   :  { %188 = vadd.xlane.f32.xlu0 %v690_v22  ;;  %v190_v23 = vmul.f32 %v690_v22, %v1231_v20 }
 0x11d   :  { %191 = vadd.xlane.f32.xlu0 %v190_v23 }
 0x1a2   :  { %v189_v24 = vpop.xlane.xlu0 %188 }
 0x1a3   :  { %945 = vrcp.f32 %v189_v24 }
 0x1a6   :  { %v192_v25 = vpop.xlane.xlu0 %191 }
 0x1a7   :  { %v691_v26 = vadd.f32 -1.0, %v192_v25 }
 0x1b0   :  { %v946_v27 = vpop.eup %945 }
 0x1b1   :  { %v195_v28 = vmul.f32 %v946_v27, %v691_v26 }
 0x1b3   :  { %vm196_vm2 = vcmp.gt.f32.partialorder %v1231_v20, %v195_v28 }
 0x1b4   :  { %v692_v29 = vsel %vm196_vm2, 1.0, %v1115_v0 }
 0x1b5   :  { %199 = vadd.xlane.f32.xlu1 %v692_v29  ;;  %v201_v30 = vmul.f32 %v692_v29, %v1231_v20 }
 0x1b9   :  { %202 = vadd.xlane.f32.xlu1 %v201_v30 }
 0x23e   :  { %v200_v31 = vpop.xlane.xlu1 %199 }
 0x23f   :  { %947 = vrcp.f32 %v200_v31 }
 0x242   :  { %v203_v32 = vpop.xlane.xlu1 %202 }
 0x243   :  { %v693_v33 = vadd.f32 -1.0, %v203_v32 }
 0x24c   :  { %v948_v34 = vpop.eup %947 }
 0x24d   :  { %v206_v35 = vmul.f32 %v948_v34, %v693_v33 }
 0x24f   :  { %vm207_vm3 = vcmp.gt.f32.partialorder %v1231_v20, %v206_v35 }
 0x250   :  { %v694_v36 = vsel %vm207_vm3, 1.0, %v1115_v0 }
 0x251   :  { %210 = vadd.xlane.f32.xlu0 %v694_v36  ;;  %v212_v37 = vmul.f32 %v694_v36, %v1231_v20 }
 0x253   :  { %213 = vadd.xlane.f32.xlu1 %v212_v37 }
 0x2da   :  { %v211_v38 = vpop.xlane.xlu0 %210 }
 0x2db   :  { %949 = vrcp.f32 %v211_v38 }
 0x2dc   :  { %v214_v39 = vpop.xlane.xlu1 %213 }
 0x2dd   :  { %v695_v40 = vadd.f32 -1.0, %v214_v39 }
 0x2e8   :  { %v950_v41 = vpop.eup %949 }
 0x2e9   :  { %v217_v42 = vmul.f32 %v950_v41, %v695_v40 }
 0x2eb   :  { %vm218_vm4 = vcmp.gt.f32.partialorder %v1231_v20, %v217_v42 }
 0x2ec   :  { %v696_v43 = vsel %vm218_vm4, 1.0, %v1115_v0 }
 0x2ed   :  { %221 = vadd.xlane.f32.xlu0 %v696_v43  ;;  %v223_v44 = vmul.f32 %v696_v43, %v1231_v20 }
 0x2ef   :  { %224 = vadd.xlane.f32.xlu1 %v223_v44 }
 0x376   :  { %v222_v45 = vpop.xlane.xlu0 %221 }
 0x377   :  { %951 = vrcp.f32 %v222_v45 }
 0x378   :  { %v225_v46 = vpop.xlane.xlu1 %224 }
 0x379   :  { %v697_v47 = vadd.f32 -1.0, %v225_v46 }
 0x384   :  { %v952_v48 = vpop.eup %951 }
 0x385   :  { %v228_v49 = vmul.f32 %v952_v48, %v697_v47 }
 0x387   :  { %vm229_vm5 = vcmp.gt.f32.partialorder %v1231_v20, %v228_v49 }
 0x388   :  { %v698_v50 = vsel %vm229_vm5, 1.0, %v1115_v0 }
 0x389   :  { %232 = vadd.xlane.f32.xlu0 %v698_v50  ;;  %v234_v51 = vmul.f32 %v698_v50, %v1231_v20 }
 0x38b   :  { %235 = vadd.xlane.f32.xlu1 %v234_v51 }
 0x412   :  { %v233_v52 = vpop.xlane.xlu0 %232 }
 0x413   :  { %953 = vrcp.f32 %v233_v52 }
 0x414   :  { %v236_v53 = vpop.xlane.xlu1 %235 }
 0x415   :  { %v699_v54 = vadd.f32 -1.0, %v236_v53 }
 0x420   :  { %v954_v55 = vpop.eup %953 }
 0x421   :  { %v239_v56 = vmul.f32 %v954_v55, %v699_v54 }
 0x423   :  { %vm240_vm6 = vcmp.gt.f32.partialorder %v1231_v20, %v239_v56 }
 0x424   :  { %v700_v57 = vsel %vm240_vm6, 1.0, %v1115_v0 }
 0x425   :  { %243 = vadd.xlane.f32.xlu0 %v700_v57  ;;  %v245_v58 = vmul.f32 %v700_v57, %v1231_v20 }
 0x427   :  { %246 = vadd.xlane.f32.xlu1 %v245_v58 }
 0x4ae   :  { %v244_v59 = vpop.xlane.xlu0 %243 }
 0x4af   :  { %955 = vrcp.f32 %v244_v59 }
 0x4b0   :  { %v247_v60 = vpop.xlane.xlu1 %246 }
 0x4b1   :  { %v701_v61 = vadd.f32 -1.0, %v247_v60 }
 0x4bc   :  { %v956_v62 = vpop.eup %955 }
 0x4bd   :  { %v250_v63 = vmul.f32 %v956_v62, %v701_v61 }
 0x4bf   :  { %vm251_vm7 = vcmp.gt.f32.partialorder %v1231_v20, %v250_v63 }
 0x4c0   :  { %v702_v1 = vsel %vm251_vm7, 1.0, %v1115_v0 }
 0x4c1   :  { %254 = vadd.xlane.f32.xlu0 %v702_v1  ;;  %v256_v2 = vmul.f32 %v702_v1, %v1231_v20 }
 0x4c3   :  { %257 = vadd.xlane.f32.xlu1 %v256_v2 }
 0x54a   :  { %v255_v3 = vpop.xlane.xlu0 %254 }
 0x54b   :  { %957 = vrcp.f32 %v255_v3 }
 0x54c   :  { %v258_v4 = vpop.xlane.xlu1 %257 }
 0x54d   :  { %v703_v5 = vadd.f32 -1.0, %v258_v4 }
 0x558   :  { %v958_v6 = vpop.eup %957 }
 0x559   :  { %v261_v7 = vmul.f32 %v958_v6, %v703_v5  ;;  %v391_v5 = vld [vmem:[#allocation5 + $0x78] sm:$0xff]  ;;  %v390_v6 = vld [vmem:[#allocation5 + $0x70] sm:$0xff] }
 0x55a   :  { %831 = vmatpush3.msra.mxu1 %v391_v5 }
 0x55b   :  { %vm262_vm8 = vcmp.gt.f32.partialorder %v1231_v20, %v261_v7  ;;  %832 = vmatprep.subr.mxu1 %v1115_v0  ;;  %v389_v7 = vld [vmem:[#allocation5 + $0x68] sm:$0xff] }
 0x55c   :  { %v704_v8 = vsel %vm262_vm8, 1.0, %v1115_v0  ;;  %833 = vmatpush3.msra.mxu1 %v390_v6 }
 0x55d   :  { %265 = vadd.xlane.f32.xlu0 %v704_v8  ;;  %v267_v9 = vmul.f32 %v704_v8, %v1231_v20  ;;  %834 = vmatprep.subr.mxu1 %v1115_v0  ;;  %v388_v8 = vld [vmem:[#allocation5 + $0x60] sm:$0xff] }
 0x55e   :  { %835 = vmatpush3.msra.mxu1 %v389_v7  ;;  %v566_v7 = vld [vmem:[#allocation8 + $0x10] sm:$0xff] }
 0x55f   :  { %268 = vadd.xlane.f32.xlu1 %v267_v9  ;;  %836 = vmatprep.subr.mxu1 %v1115_v0  ;;  %v387_v9 = vld [vmem:[#allocation5 + $0x58] sm:$0xff] }
 0x560   :  { %837 = vmatpush3.msra.mxu1 %v388_v8  ;;  %v565_v8 = vld [vmem:[#allocation8 + $0x8] sm:$0xff] }
 0x561   :  { %838 = vmatprep.subr.mxu1 %v1115_v0 }
 0x562   :  { %839 = vmatpush3.msra.mxu1 %v387_v9  ;;  %v564_v9 = vld [vmem:[#allocation8] sm:$0xff] }
 0x563   :  { %840 = vmatprep.subr.mxu1 %v1115_v0 }
 0x5e6   :  { %v266_v10 = vpop.xlane.xlu0 %265 }
 0x5e7   :  { %959 = vrcp.f32 %v266_v10 }
 0x5e8   :  { %v269_v11 = vpop.xlane.xlu1 %268 }
 0x5e9   :  { %v705_v12 = vadd.f32 -1.0, %v269_v11 }
 0x5f4   :  { %v960_v13 = vpop.eup %959 }
 0x5f5   :  { %v272_v14 = vmul.f32 %v960_v13, %v705_v12 }
 0x5f7   :  { %vm273_vm9 = vcmp.gt.f32.partialorder %v1231_v20, %v272_v14 }
 0x5f8   :  { %v706_v15 = vsel %vm273_vm9, 1.0, %v1115_v0 }
 0x5f9   :  { %276 = vadd.xlane.f32.xlu0 %v706_v15  ;;  %v278_v16 = vmul.f32 %v706_v15, %v1231_v20 }
 0x5fb   :  { %279 = vadd.xlane.f32.xlu1 %v278_v16 }
 0x682   :  { %v277_v18 = vpop.xlane.xlu0 %276 }
 0x683   :  { %961 = vrcp.f32 %v277_v18  ;;  %v386_v18 = vld [vmem:[#allocation5 + $0x50] sm:$0xff] }
 0x684   :  { %v280_v19 = vpop.xlane.xlu1 %279  ;;  %841 = vmatpush3.msra.mxu1 %v386_v18 }
 0x685   :  { %v707_v21 = vadd.f32 -1.0, %v280_v19  ;;  %842 = vmatprep.subr.mxu1 %v1115_v0  ;;  %v385_v19 = vld [vmem:[#allocation5 + $0x48] sm:$0xff] }
 0x686   :  { %843 = vmatpush3.msra.mxu1 %v385_v19 }
 0x687   :  { %844 = vmatprep.subr.mxu1 %v1115_v0 }
 0x690   :  { %v962_v22 = vpop.eup %961 }
 0x691   :  { %v283_v23 = vmul.f32 %v962_v22, %v707_v21  ;;  %v384_v21 = vld [vmem:[#allocation5 + $0x40] sm:$0xff]  ;;  %v383_v22 = vld [vmem:[#allocation5 + $0x38] sm:$0xff] }
 0x692   :  { %845 = vmatpush3.msra.mxu1 %v384_v21 }
 0x693   :  { %vm284_vm10 = vcmp.gt.f32.partialorder %v1231_v20, %v283_v23  ;;  %846 = vmatprep.subr.mxu1 %v1115_v0  ;;  %v382_v23 = vld [vmem:[#allocation5 + $0x30] sm:$0xff] }
 0x694   :  { %v708_v24 = vsel %vm284_vm10, 1.0, %v1115_v0  ;;  %847 = vmatpush3.msra.mxu1 %v383_v22 }
 0x695   :  { %287 = vadd.xlane.f32.xlu0 %v708_v24  ;;  %v289_v25 = vmul.f32 %v708_v24, %v1231_v20  ;;  %848 = vmatprep.subr.mxu1 %v1115_v0  ;;  %v381_v24 = vld [vmem:[#allocation5 + $0x28] sm:$0xff] }
 0x696   :  { %849 = vmatpush3.msra.mxu1 %v382_v23 }
 0x697   :  { %290 = vadd.xlane.f32.xlu1 %v289_v25  ;;  %850 = vmatprep.subr.mxu1 %v1115_v0  ;;  %v380_v25 = vld [vmem:[#allocation5 + $0x20] sm:$0xff] }
 0x698   :  { %851 = vmatpush3.msra.mxu1 %v381_v24 }
 0x699   :  { %852 = vmatprep.subr.mxu1 %v1115_v0 }
 0x69a   :  { %853 = vmatpush3.msra.mxu1 %v380_v25 }
 0x69b   :  { %854 = vmatprep.subr.mxu1 %v1115_v0 }
 0x71e   :  { %v288_v26 = vpop.xlane.xlu0 %287 }
 0x71f   :  { %963 = vrcp.f32 %v288_v26  ;;  %v379_v26 = vld [vmem:[#allocation5 + $0x18] sm:$0xff] }
 0x720   :  { %v291_v27 = vpop.xlane.xlu1 %290  ;;  %855 = vmatpush3.msra.mxu1 %v379_v26 }
 0x721   :  { %v709_v28 = vadd.f32 -1.0, %v291_v27  ;;  %856 = vmatprep.subr.mxu1 %v1115_v0  ;;  %v378_v27 = vld [vmem:[#allocation5 + $0x10] sm:$0xff] }
 0x722   :  { %857 = vmatpush3.msra.mxu1 %v378_v27 }
 0x723   :  { %858 = vmatprep.subr.mxu1 %v1115_v0 }
 0x72c   :  { %v964_v29 = vpop.eup %963 }
 0x72d   :  { %v294_v30 = vmul.f32 %v964_v29, %v709_v28  ;;  %v377_v28 = vld [vmem:[#allocation5 + $0x8] sm:$0xff]  ;;  %v376_v29 = vld [vmem:[#allocation5] sm:$0xff] }
 0x72e   :  { %859 = vmatpush3.msra.mxu1 %v377_v28 }
 0x72f   :  { %vm295_vm11 = vcmp.gt.f32.partialorder %v1231_v20, %v294_v30  ;;  %860 = vmatprep.subr.mxu1 %v1115_v0  ;;  %v485_v30 = vld [vmem:[#allocation7 + $0x78] sm:$0xff] }
 0x730   :  { %v710_v31 = vsel %vm295_vm11, 1.0, %v1115_v0  ;;  %861 = vmatpush3.msra.mxu1 %v376_v29  ;;  %866 = vmatpush3.msra.mxu0 %v485_v30 }
 0x731   :  { %298 = vadd.xlane.f32.xlu0 %v710_v31  ;;  %v300_v32 = vmul.f32 %v710_v31, %v1231_v20  ;;  %v484_v31 = vld [vmem:[#allocation7 + $0x70] sm:$0xff]  ;;  %900 = vmatprep.subr.mxu1 %v1115_v0 }
 0x732   :  { %867 = vmatprep.subr.mxu0 %v1115_v0 }
 0x733   :  { %301 = vadd.xlane.f32.xlu1 %v300_v32  ;;  %v483_v32 = vld [vmem:[#allocation7 + $0x68] sm:$0xff]  ;;  %868 = vmatpush3.msra.mxu0 %v484_v31 }
 0x734   :  { %869 = vmatprep.subr.mxu0 %v1115_v0 }
 0x735   :  { %870 = vmatpush3.msra.mxu0 %v483_v32 }
 0x736   :  { %871 = vmatprep.subr.mxu0 %v1115_v0 }
 0x7ba   :  { %v299_v33 = vpop.xlane.xlu0 %298 }
 0x7bb   :  { %965 = vrcp.f32 %v299_v33  ;;  %v482_v33 = vld [vmem:[#allocation7 + $0x60] sm:$0xff] }
 0x7bc   :  { %v302_v34 = vpop.xlane.xlu1 %301  ;;  %872 = vmatpush3.msra.mxu0 %v482_v33 }
 0x7bd   :  { %v711_v35 = vadd.f32 -1.0, %v302_v34  ;;  %v481_v34 = vld [vmem:[#allocation7 + $0x58] sm:$0xff]  ;;  %873 = vmatprep.subr.mxu0 %v1115_v0 }
 0x7be   :  { %874 = vmatpush3.msra.mxu0 %v481_v34 }
 0x7bf   :  { %875 = vmatprep.subr.mxu0 %v1115_v0 }
 0x7c8   :  { %v966_v36 = vpop.eup %965 }
 0x7c9   :  { %v305_v37 = vmul.f32 %v966_v36, %v711_v35  ;;  %v480_v35 = vld [vmem:[#allocation7 + $0x50] sm:$0xff]  ;;  %v479_v36 = vld [vmem:[#allocation7 + $0x48] sm:$0xff] }
 0x7ca   :  { %876 = vmatpush3.msra.mxu0 %v480_v35 }
 0x7cb   :  { %vm306_vm12 = vcmp.gt.f32.partialorder %v1231_v20, %v305_v37  ;;  %877 = vmatprep.subr.mxu0 %v1115_v0  ;;  %v478_v37 = vld [vmem:[#allocation7 + $0x40] sm:$0xff] }
 0x7cc   :  { %v712_v38 = vsel %vm306_vm12, 1.0, %v1115_v0  ;;  %878 = vmatpush3.msra.mxu0 %v479_v36 }
 0x7cd   :  { %309 = vadd.xlane.f32.xlu0 %v712_v38  ;;  %v311_v39 = vmul.f32 %v712_v38, %v1231_v20  ;;  %879 = vmatprep.subr.mxu0 %v1115_v0  ;;  %v477_v38 = vld [vmem:[#allocation7 + $0x38] sm:$0xff] }
 0x7ce   :  { %880 = vmatpush3.msra.mxu0 %v478_v37 }
 0x7cf   :  { %312 = vadd.xlane.f32.xlu1 %v311_v39  ;;  %881 = vmatprep.subr.mxu0 %v1115_v0  ;;  %v476_v39 = vld [vmem:[#allocation7 + $0x30] sm:$0xff] }
 0x7d0   :  { %882 = vmatpush3.msra.mxu0 %v477_v38 }
 0x7d1   :  { %883 = vmatprep.subr.mxu0 %v1115_v0 }
 0x7d2   :  { %884 = vmatpush3.msra.mxu0 %v476_v39 }
 0x7d3   :  { %885 = vmatprep.subr.mxu0 %v1115_v0 }
 0x856   :  { %v310_v40 = vpop.xlane.xlu0 %309 }
 0x857   :  { %967 = vrcp.f32 %v310_v40  ;;  %v475_v40 = vld [vmem:[#allocation7 + $0x28] sm:$0xff] }
 0x858   :  { %v313_v41 = vpop.xlane.xlu1 %312  ;;  %886 = vmatpush3.msra.mxu0 %v475_v40 }
 0x859   :  { %v713_v42 = vadd.f32 -1.0, %v313_v41  ;;  %v474_v41 = vld [vmem:[#allocation7 + $0x20] sm:$0xff]  ;;  %887 = vmatprep.subr.mxu0 %v1115_v0 }
 0x85a   :  { %888 = vmatpush3.msra.mxu0 %v474_v41 }
 0x85b   :  { %889 = vmatprep.subr.mxu0 %v1115_v0 }
 0x864   :  { %v968_v43 = vpop.eup %967 }
 0x865   :  { %v316_v44 = vmul.f32 %v968_v43, %v713_v42  ;;  %v473_v42 = vld [vmem:[#allocation7 + $0x18] sm:$0xff] }
 0x866   :  { %890 = vmatpush3.msra.mxu0 %v473_v42 }
 0x867   :  { %vm317_vm13 = vcmp.gt.f32.partialorder %v1231_v20, %v316_v44  ;;  %891 = vmatprep.subr.mxu0 %v1115_v0 }
 0x868   :  { %v714_v45 = vsel %vm317_vm13, 1.0, %v1115_v0 }
 0x869   :  { %320 = vadd.xlane.f32.xlu0 %v714_v45  ;;  %v322_v46 = vmul.f32 %v714_v45, %v1231_v20 }
 0x86b   :  { %323 = vadd.xlane.f32.xlu1 %v322_v46 }
 0x8f2   :  { %v321_v47 = vpop.xlane.xlu0 %320 }
 0x8f3   :  { %969 = vrcp.f32 %v321_v47 }
 0x8f4   :  { %v324_v48 = vpop.xlane.xlu1 %323 }
 0x8f5   :  { %v715_v49 = vadd.f32 -1.0, %v324_v48 }
 0x900   :  { %v970_v50 = vpop.eup %969 }
 0x901   :  { %v327_v51 = vmul.f32 %v970_v50, %v715_v49 }
 0x903   :  { %vm328_vm14 = vcmp.gt.f32.partialorder %v1231_v20, %v327_v51  ;;  %v472_v51 = vld [vmem:[#allocation7 + $0x10] sm:$0xff] }
 0x904   :  { %v716_v52 = vsel %vm328_vm14, 1.0, %v1115_v0  ;;  %892 = vmatpush3.msra.mxu0 %v472_v51 }
 0x905   :  { %331 = vadd.xlane.f32.xlu0 %v716_v52  ;;  %v333_v53 = vmul.f32 %v716_v52, %v1231_v20  ;;  %893 = vmatprep.subr.mxu0 %v1115_v0  ;;  %v471_v52 = vld [vmem:[#allocation7 + $0x8] sm:$0xff] }
 0x906   :  { %894 = vmatpush3.msra.mxu0 %v471_v52 }
 0x907   :  { %334 = vadd.xlane.f32.xlu1 %v333_v53  ;;  %895 = vmatprep.subr.mxu0 %v1115_v0  ;;  %v470_v53 = vld [vmem:[#allocation7] sm:$0xff] }
 0x908   :  { %896 = vmatpush3.msra.mxu0 %v470_v53 }
 0x98e   :  { %v332_v54 = vpop.xlane.xlu0 %331 }
 0x98f   :  { %971 = vrcp.f32 %v332_v54  ;;  %v579_v54 = vld [vmem:[#allocation8 + $0x78] sm:$0xff] }
 0x990   :  { %v335_v55 = vpop.xlane.xlu1 %334 }
 0x991   :  { %v717_v56 = vadd.f32 -1.0, %v335_v55  ;;  %v576_v55 = vld [vmem:[#allocation8 + $0x60] sm:$0xff] }
 0x99c   :  { %v972_v57 = vpop.eup %971 }
 0x99d   :  { %v338_v58 = vmul.f32 %v972_v57, %v717_v56  ;;  %v575_v56 = vld [vmem:[#allocation8 + $0x58] sm:$0xff]  ;;  %v574_v57 = vld [vmem:[#allocation8 + $0x50] sm:$0xff] }
 0x99f   :  { %vm339_vm15 = vcmp.gt.f32.partialorder %v1231_v20, %v338_v58  ;;  %v573_v58 = vld [vmem:[#allocation8 + $0x48] sm:$0xff] }
 0x9a0   :  { %v718_v59 = vsel %vm339_vm15, 1.0, %v1115_v0 }
 0x9a1   :  { %342 = vadd.xlane.f32.xlu0 %v718_v59  ;;  %v344_v60 = vmul.f32 %v718_v59, %v1231_v20  ;;  %v572_v59 = vld [vmem:[#allocation8 + $0x40] sm:$0xff] }
 0x9a3   :  { %345 = vadd.xlane.f32.xlu1 %v344_v60  ;;  %v571_v60 = vld [vmem:[#allocation8 + $0x38] sm:$0xff] }
 0xa2a   :  { %v343_v61 = vpop.xlane.xlu0 %342 }
 0xa2b   :  { %973 = vrcp.f32 %v343_v61  ;;  %v570_v61 = vld [vmem:[#allocation8 + $0x30] sm:$0xff] }
 0xa2c   :  { %v346_v62 = vpop.xlane.xlu1 %345 }
 0xa2d   :  { %v719_v63 = vadd.f32 -1.0, %v346_v62  ;;  %v569_v62 = vld [vmem:[#allocation8 + $0x28] sm:$0xff] }
 0xa38   :  { %v974_v1 = vpop.eup %973 }
 0xa39   :  { %v349_v2 = vmul.f32 %v974_v1, %v719_v63  ;;  %v568_v63 = vld [vmem:[#allocation8 + $0x20] sm:$0xff]  ;;  %v567_v1 = vld [vmem:[#allocation8 + $0x18] sm:$0xff] }
 0xa3b   :  { %vm350_vm1 = vcmp.gt.f32.partialorder %v1231_v20, %v349_v2  ;;  %v724_v2 = vld [vmem:[%s1353_s4] ss:$0 sm:$0xff]  ;;  %s1117_s4 = smov [#allocation11]  }
 0xa3c   :  { %v720_v3 = vsel %vm350_vm1, 1.0, %v1115_v0  ;;  %s674_s17 = sshll.u32 %s1117_s4, 4  ;;  %s675_s17 = int_to_ptr.vmem [resolvable:$true] %s674_s17 }
 0xa3d   :  { %353 = vadd.xlane.f32.xlu0 %v720_v3  ;;  %v355_v4 = vmul.f32 %v720_v3, %v1231_v20  ;;  %s1059_s18 = scalar_lea.vmem %s675_s17, 128  ;;  %p1064_p7 = scmp.lt.s32.totalorder %s675_s17, %s675_s17 }
 0xa3e   :  { %p1060_p6 = scmp.ne.s32.totalorder %s675_s17, %s1059_s18  ;;  %p1065_p8 = scmp.lt.s32.totalorder %s1059_s18, %s1059_s18 }
 0xa3f   :  { %356 = vadd.xlane.f32.xlu1 %v355_v4 }
 0xa40   :  { %p1066_p9 = por %p1065_p8, %p1064_p7 }
 0xa42   :  { %p1067_p10 = pnand %p1066_p9, %p1060_p6 }
 0xac6   :  { %v354_v10 = vpop.xlane.xlu0 %353 }
 0xac7   :  { %975 = vrcp.f32 %v354_v10  ;;  %v725_v10 = vld [vmem:[%s1355_s6] ss:$0 sm:$0xff] }
 0xac8   :  { %v357_v11 = vpop.xlane.xlu1 %356 }
 0xac9   :  { %v721_v12 = vadd.f32 -1.0, %v357_v11 }
 0xad4   :  { %v976_v13 = vpop.eup %975 }
 0xad5   :  { %v360_v14 = vmul.f32 %v976_v13, %v721_v12 }
 0xad7   :  { %vm361_vm2 = vcmp.gt.f32.partialorder %v1231_v20, %v360_v14 }
 0xad8   :  { %v722_v15 = vsel %vm361_vm2, 1.0, %v1115_v0 }
 0xad9   :  { %364 = vadd.xlane.f32.xlu0 %v722_v15  ;;  %v366_v16 = vmul.f32 %v722_v15, %v1231_v20 }
 0xadb   :  { %367 = vadd.xlane.f32.xlu1 %v366_v16 }
 0xb62   :  { %v365_v43 = vpop.xlane.xlu0 %364 }
 0xb63   :  { %977 = vrcp.f32 %v365_v43 }
 0xb64   :  { %v368_v44 = vpop.xlane.xlu1 %367 }
 0xb65   :  { %v723_v45 = vadd.f32 -1.0, %v368_v44 }
 0xb70   :  { %v978_v46 = vpop.eup %977 }
 0xb71   :  { %v371_v47 = vmul.f32 %v978_v46, %v723_v45 }
 0xb73   :  { %v372_v48 = vsub.f32 %v1231_v20, %v371_v47  ;;  %v578_v20 = vld [vmem:[#allocation8 + $0x70] sm:$0xff] }
 0xb75   :  { %v373_v49 = vmax.f32 %v372_v48, 0.0 }
 0xb77   :  { %374 = vst [vmem:[#allocation11] sm:$0xff] %v373_v49  ;;  %v375_v50 = vmul.f32 %v373_v49, %v1221_v17  ;;  %v577_v17 = vld [vmem:[#allocation8 + $0x68] sm:$0xff] }
 0xb79   :  { %863 = vmatmul.mubr.f32.vlgmr.msra.gmra.mxu1 %v375_v50 }
 0xb7a   :  { %932 = vmatprep.mubr.msk.f32.mxu1 %vm1116_vm0, %v1115_v0  ;;  %901 = vmatpush3.msra.mxu1 %v579_v54 }
 0xb7b   :  { %902 = vmatprep.subr.mxu1 %v1115_v0 }
 0xb7c   :  { %903 = vmatpush3.msra.mxu1 %v578_v20 }
 0xb7d   :  { %904 = vmatprep.subr.mxu1 %v1115_v0 }
 0xb7e   :  { %905 = vmatpush3.msra.mxu1 %v577_v17 }
 0xb7f   :  { %906 = vmatprep.subr.mxu1 %v1115_v0 }
 0xb80   :  { %907 = vmatpush3.msra.mxu1 %v576_v55 }
 0xb81   :  { %908 = vmatprep.subr.mxu1 %v1115_v0 }
 0xb82   :  { %909 = vmatpush3.msra.mxu1 %v575_v56 }
 0xb83   :  { %910 = vmatprep.subr.mxu1 %v1115_v0 }
 0xb84   :  { %911 = vmatpush3.msra.mxu1 %v574_v57 }
 0xb85   :  { %912 = vmatprep.subr.mxu1 %v1115_v0 }
 0xb86   :  { %913 = vmatpush3.msra.mxu1 %v573_v58 }
 0xb87   :  { %914 = vmatprep.subr.mxu1 %v1115_v0 }
 0xb88   :  { %915 = vmatpush3.msra.mxu1 %v572_v59 }
 0xb89   :  { %916 = vmatprep.subr.mxu1 %v1115_v0 }
 0xb8a   :  { %917 = vmatpush3.msra.mxu1 %v571_v60 }
 0xb8b   :  { %918 = vmatprep.subr.mxu1 %v1115_v0 }
 0xb8c   :  { %919 = vmatpush3.msra.mxu1 %v570_v61 }
 0xb8d   :  { %920 = vmatprep.subr.mxu1 %v1115_v0 }
 0xb8e   :  { %921 = vmatpush3.msra.mxu1 %v569_v62 }
 0xb8f   :  { %922 = vmatprep.subr.mxu1 %v1115_v0 }
 0xb90   :  { %923 = vmatpush3.msra.mxu1 %v568_v63 }
 0xb91   :  { %924 = vmatprep.subr.mxu1 %v1115_v0 }
 0xb92   :  { %925 = vmatpush3.msra.mxu1 %v567_v1 }
 0xb93   :  { %926 = vmatprep.subr.mxu1 %v1115_v0 }
 0xb94   :  { %927 = vmatpush3.msra.mxu1 %v566_v7 }
 0xb95   :  { %928 = vmatprep.subr.mxu1 %v1115_v0 }
 0xb96   :  { %929 = vmatpush3.msra.mxu1 %v565_v8 }
 0xb97   :  { %930 = vmatprep.subr.mxu1 %v1115_v0 }
 0xb98   :  { %931 = vmatpush3.msra.mxu1 %v564_v9 }
 0xc39   :  { %v465_v3 = vpop.f32.mrf.mxu1 }
 0xc3a   :  { %v466_v4 = vadd.f32 %v724_v2, %v465_v3 }
 0xc3b   :  { %v864_v5 = vpop.f32.mrf.mxu1 }
 0xc3c   :  { %v469_v6 = vmax.f32 %v466_v4, 0.0 }
 0xc3e   :  { %898 = vmatmul.mubr.f32.vlgmr.msra.gmra.mxu0 %v469_v6 }
 0xcfe   :  { %v559_v11 = vpop.f32.mrf.mxu0 }
 0xcff   :  { %v560_v12 = vadd.f32 %v725_v10, %v559_v11 }
 0xd00   :  { %v899_v13 = vpop.f32.mrf.mxu0 }
 0xd01   :  { %v563_v14 = vmax.f32 %v560_v12, 0.0 }
 0xd03   :  { %933 = vmatmul.mubr.f32.vlgmr.msra.gmra.mxu1 %v563_v14 }
 0xd04   :  { %1070 = shalt.err (!%p1067_p10)
}
 0xd05   :  { %677 = dma.vmem_to_hbm [thread:$0]  %s675_s17, 128, %s1359_s10, [#allocation12]   ;;  %v726_v0 = vld [vmem:[%s1357_s8] ss:$0 sm:$0xff] }
 0xd06   :  { %s1118_s22 = smov [#allocation10]  }
 0xd07   :  { %s664_s23 = sshll.u32 %s1118_s22, 4  ;;  %s665_s23 = int_to_ptr.vmem [resolvable:$true] %s664_s23 }
 0xd08   :  { %s1079_s24 = scalar_lea.vmem %s665_s23, 128  ;;  %p1084_p12 = scmp.lt.s32.totalorder %s665_s23, %s665_s23 }
 0xd09   :  { %p1080_p11 = scmp.ne.s32.totalorder %s665_s23, %s1079_s24  ;;  %p1085_p13 = scmp.lt.s32.totalorder %s1079_s24, %s1079_s24 }
 0xd0b   :  { %p1086_p0 = por %p1085_p13, %p1084_p12 }
 0xd0d   :  { %p1087_p1 = pnand %p1086_p0, %p1080_p11 }
 0xdc3   :  { %v653_v15 = vpop.f32.mrf.mxu1 }
 0xdc4   :  { %v654_v16 = vadd.f32 %v726_v0, %v653_v15 }
 0xdc5   :  { %v934_v18 = vpop.f32.mrf.mxu1 }
 0xdc6   :  { %657 = vst [vmem:[#allocation10] sm:$0xff] %v654_v16 }
 0xdc7   :  { %1090 = shalt.err (!%p1087_p1)
}
 0xdc8   :  { %667 = dma.vmem_to_hbm [thread:$0]  %s665_s23, 128, %s1358_s9, [#allocation4]  }
 0xdc9   :  { %1105 = dma.done.wait [#allocation4], 128  }
 0xdca   :  { %1106 = vsyncadd [#allocation4], 4294967168 }
 0xdcb   :  { %1107 = dma.done.wait [#allocation12], 128  }
 0xdcc   :  { %1108 = vsyncadd [#allocation12], 4294967168 }
 0xdcd   :  { %684 = vsyncpa [#allocation3], 1 }
 0xdce   :  { %685 = vsyncpa [#allocation6], 1 }
 0xdcf   :  { %686 = vsyncpa [#allocation9], 1 }
 0xdd0   :  { %687 = vsyncpa [#allocation4], 1 }
 0xdd1   :  { %688 = vsyncpa [#allocation12], 1 }

</bundles_post_ra>
